<compile_context>
chip_gen: v7x
topology: tpu7x:2x2x1
jax: 0.10.0
libtpu: 0.0.40
codegen_flags: <defaults>
</compile_context>

<pallas_src>
import math
import functools

import jax
import jax.numpy as jnp
from jax.experimental import pallas as pl
from jax.experimental.pallas import tpu as pltpu


def _self_attention_kernel(num_heads, head_size, eps,
                           x_ref, wqkv_ref, bqkv_ref, wd_ref, bd_ref,
                           gamma_ref, beta_ref, wr_ref, br_ref,
                           out_ref):
    # One batch element per grid step.  x block: (1, S, D_in).
    x = x_ref[0]                                        # (S, D_in) f32
    S, D_in = x.shape
    H, dh = num_heads, head_size

    # ---- fused QKV projection, produced directly in head-major layout ----
    xb = x.astype(jnp.bfloat16)
    xh = jnp.broadcast_to(xb, (H, S, D_in))             # (H, S, D_in) bf16
    qkv = jnp.einsum("hsd,hdf->hsf", xh, wqkv_ref[...],
                     preferred_element_type=jnp.float32)          # (H, S, 3*dh) f32
    qkv = qkv + bqkv_ref[...]                                      # (H, 1, 3*dh) broadcast

    scale = 1.0 / math.sqrt(dh)
    q = (qkv[:, :, 0:dh] * scale).astype(jnp.bfloat16)             # scale fused here (f32)
    k = qkv[:, :, dh:2 * dh].astype(jnp.bfloat16)
    v = qkv[:, :, 2 * dh:3 * dh].astype(jnp.bfloat16)

    # ---- scaled-dot-product attention, all heads batched ----
    s = jnp.einsum("hqd,hkd->hqk", q, k,
                   preferred_element_type=jnp.float32)             # (H, S, S) f32
    m = jnp.max(s, axis=-1, keepdims=True)
    p = jnp.exp(s - m)
    denom = jnp.sum(p, axis=-1, keepdims=True)
    p = p * pl.reciprocal(denom, approx=True)                      # softmax (f32), EUP recip
    # attn_dropout: identity (eval mode)
    ctx = jnp.einsum("hqk,hkd->hqd", p.astype(jnp.bfloat16), v,
                     preferred_element_type=jnp.float32)           # (H, S, dh) f32

    # ---- output dense; head re-combination folded into per-head weights ----
    hs_h = jnp.einsum("hsd,hdo->hso", ctx.astype(jnp.bfloat16), wd_ref[...],
                      preferred_element_type=jnp.float32)          # (H, S, hidden)
    hs = jnp.sum(hs_h, axis=0) + bd_ref[...]                       # (S, hidden)
    # out_dropout: identity (eval mode)
    hs = hs + x                                                    # residual

    # ---- LayerNorm (TF-style, eps inside sqrt), f32 ----
    u = jnp.mean(hs, axis=-1, keepdims=True)
    d = hs - u
    var = jnp.mean(d * d, axis=-1, keepdims=True)
    hs = gamma_ref[...] * (d * jax.lax.rsqrt(var + eps)) + beta_ref[...]

    # ---- classifier head (output lanes padded to 128 -> lane-dense store) ----
    res = jnp.dot(hs.astype(jnp.bfloat16), wr_ref[...],
                  preferred_element_type=jnp.float32) + br_ref[...]   # (S, OUT_PAD)
    out_ref[0] = res.astype(out_ref.dtype)


def self_attention_forward(x, params, num_heads):
    """x: (B, S, input_size) float32. params: Linear weights stored (in, out), biases (1, d)."""
    B, S, D_in = x.shape
    hidden = params["wq"].shape[1]
    class_size = params["wr"].shape[1]
    assert hidden % num_heads == 0
    assert D_in == hidden, "residual add requires input_size == hidden_size"
    H = num_heads
    dh = hidden // H
    out_pad = max(128, ((class_size + 127) // 128) * 128)   # lane-dense output width

    f32, bf16 = jnp.float32, jnp.bfloat16

    # ---- one-time weight repacking in the wrapper (not timed per step) ----
    def head_major(w):                      # (D_in, H*dh) -> (H, D_in, dh)
        return jnp.transpose(w.reshape(D_in, H, dh), (1, 0, 2))

    def head_bias(b):                       # (1, H*dh) -> (H, 1, dh)
        return b.reshape(H, dh)[:, None, :]

    wqkv = jnp.concatenate([head_major(params["wq"]),
                            head_major(params["wk"]),
                            head_major(params["wv"])], axis=-1).astype(bf16)   # (H, D_in, 3*dh)
    bqkv = jnp.concatenate([head_bias(params["bq"]),
                            head_bias(params["bk"]),
                            head_bias(params["bv"])], axis=-1).astype(f32)     # (H, 1, 3*dh)

    wd = params["wd"].reshape(H, dh, hidden).astype(bf16)    # (H, dh, hidden): folds the
    bd = params["bd"].astype(f32)                            # torch permute+reshape concat

    wr = jnp.zeros((hidden, out_pad), bf16).at[:, :class_size].set(params["wr"].astype(bf16))
    br = jnp.zeros((1, out_pad), f32).at[:, :class_size].set(params["br"].astype(f32))

    gamma = params["gamma"].astype(f32)
    beta = params["beta"].astype(f32)

    kernel = functools.partial(_self_attention_kernel, H, dh, 1e-12)

    def full_spec(arr):
        nd = arr.ndim
        return pl.BlockSpec(arr.shape, lambda b, _nd=nd: (0,) * _nd)  # constant -> no re-DMA

    weights = [wqkv, bqkv, wd, bd, gamma, beta, wr, br]
    in_specs = [pl.BlockSpec((1, S, D_in), lambda b: (b, 0, 0))] + [full_spec(w) for w in weights]
    out_spec = pl.BlockSpec((1, S, out_pad), lambda b: (b, 0, 0))

    out = pl.pallas_call(
        kernel,
        out_shape=jax.ShapeDtypeStruct((B, S, out_pad), x.dtype),
        grid_spec=pltpu.PrefetchScalarGridSpec(
            num_scalar_prefetch=0,
            grid=(B,),                       # B=2 -> 2-way parallel (feeds both v7x TCs)
            in_specs=in_specs,
            out_specs=out_spec,
        ),
        compiler_params=pltpu.CompilerParams(
            dimension_semantics=("parallel",),
            vmem_limit_bytes=32 * 1024 * 1024,   # explicit budget; safe on v5e/v6e/v7x
        ),
    )(x, *weights)
    return out[:, :, :class_size]


def reference_forward(x, params, num_heads):
    """Pure-JAX f32 reference matching the PyTorch module (dropout = identity)."""
    B, S, _ = x.shape
    hidden = params["wq"].shape[1]
    dh = hidden // num_heads

    def lin(a, w, b):
        return a @ w + b[0]

    q = lin(x, params["wq"], params["bq"]).reshape(B, S, num_heads, dh).transpose(0, 2, 1, 3)
    k = lin(x, params["wk"], params["bk"]).reshape(B, S, num_heads, dh).transpose(0, 2, 1, 3)
    v = lin(x, params["wv"], params["bv"]).reshape(B, S, num_heads, dh).transpose(0, 2, 1, 3)
    scores = jnp.einsum("bhqd,bhkd->bhqk", q, k) / math.sqrt(dh)
    probs = jax.nn.softmax(scores, axis=-1)
    ctx = jnp.einsum("bhqk,bhkd->bhqd", probs, v).transpose(0, 2, 1, 3).reshape(B, S, hidden)
    hs = lin(ctx, params["wd"], params["bd"]) + x
    u = hs.mean(-1, keepdims=True)
    s = ((hs - u) ** 2).mean(-1, keepdims=True)
    hs = (hs - u) / jnp.sqrt(s + 1e-12)
    hs = params["gamma"][0] * hs + params["beta"][0]
    return lin(hs, params["wr"], params["br"])


if __name__ == "__main__":
    # Small, forward-consistent shapes: input_size == hidden_size (required by the residual add).
    B, S = 2, 8
    input_size = hidden_size = 32
    num_heads = 4
    class_size = 8

    key = jax.random.PRNGKey(0)
    ks = jax.random.split(key, 12)

    def linw(k, d_in, d_out):
        return 0.1 * jax.random.normal(k, (d_in, d_out), jnp.float32)   # stored as (in, out)

    params = {
        "wq": linw(ks[0], input_size, hidden_size),
        "bq": 0.1 * jax.random.normal(ks[1], (1, hidden_size), jnp.float32),
        "wk": linw(ks[2], input_size, hidden_size),
        "bk": 0.1 * jax.random.normal(ks[3], (1, hidden_size), jnp.float32),
        "wv": linw(ks[4], input_size, hidden_size),
        "bv": 0.1 * jax.random.normal(ks[5], (1, hidden_size), jnp.float32),
        "wd": linw(ks[6], hidden_size, hidden_size),
        "bd": 0.1 * jax.random.normal(ks[7], (1, hidden_size), jnp.float32),
        "gamma": jnp.ones((1, hidden_size), jnp.float32),
        "beta": jnp.zeros((1, hidden_size), jnp.float32),
        "wr": linw(ks[8], hidden_size, class_size),
        "br": 0.1 * jax.random.normal(ks[9], (1, class_size), jnp.float32),
    }

    x = jax.random.normal(ks[10], (B, S, input_size), jnp.float32)

    out = self_attention_forward(x, params, num_heads)
    out = jax.block_until_ready(out)

    ref = reference_forward(x, params, num_heads)
    assert out.shape == (B, S, class_size)
    max_err = float(jnp.max(jnp.abs(out - ref)))
    # bf16 MXU inputs + approx reciprocal -> relaxed tolerance (per perf-review guidance).
    assert jnp.allclose(out, ref, atol=3e-2, rtol=3e-2), f"mismatch vs JAX reference: {max_err}"

    print("KERNEL_OK")
</pallas_src>

<mosaic_0001>
module attributes {stable_mosaic.version = 11 : i64} {
  func.func @_self_attention_kernel(%arg0: i32, %arg1: memref<1x8x32xf32, #tpu.memory_space<vmem>>, %arg2: memref<4x32x24xbf16, #tpu.memory_space<vmem>>, %arg3: memref<4x1x24xf32, #tpu.memory_space<vmem>>, %arg4: memref<4x8x32xbf16, #tpu.memory_space<vmem>>, %arg5: memref<1x32xf32, #tpu.memory_space<vmem>>, %arg6: memref<1x32xf32, #tpu.memory_space<vmem>>, %arg7: memref<1x32xf32, #tpu.memory_space<vmem>>, %arg8: memref<32x128xbf16, #tpu.memory_space<vmem>>, %arg9: memref<1x128xf32, #tpu.memory_space<vmem>>, %arg10: memref<1x8x128xf32, #tpu.memory_space<vmem>>) attributes {dimension_semantics = [#tpu.dimension_semantics<parallel>], iteration_bounds = array<i64: 2>, scalar_prefetch = 0 : i64, scratch_operands = 0 : i64, tpu.core_type = #tpu.core_type<tc>, window_params = [{transform_indices = @transform_0, window_bounds = array<i64: 1, 8, 32>}, {pipeline_mode = #tpu.pipeline_mode<synchronous>, transform_indices = @transform_1, window_bounds = array<i64: 4, 32, 24>}, {pipeline_mode = #tpu.pipeline_mode<synchronous>, transform_indices = @transform_2, window_bounds = array<i64: 4, 1, 24>}, {pipeline_mode = #tpu.pipeline_mode<synchronous>, transform_indices = @transform_3, window_bounds = array<i64: 4, 8, 32>}, {pipeline_mode = #tpu.pipeline_mode<synchronous>, transform_indices = @transform_4, window_bounds = array<i64: 1, 32>}, {pipeline_mode = #tpu.pipeline_mode<synchronous>, transform_indices = @transform_5, window_bounds = array<i64: 1, 32>}, {pipeline_mode = #tpu.pipeline_mode<synchronous>, transform_indices = @transform_6, window_bounds = array<i64: 1, 32>}, {pipeline_mode = #tpu.pipeline_mode<synchronous>, transform_indices = @transform_7, window_bounds = array<i64: 32, 128>}, {pipeline_mode = #tpu.pipeline_mode<synchronous>, transform_indices = @transform_8, window_bounds = array<i64: 1, 128>}, {transform_indices = @transform_9, window_bounds = array<i64: 1, 8, 128>}]} {
    %c0 = arith.constant 0 : index
    %c0_0 = arith.constant 0 : index
    %c0_1 = arith.constant 0 : index
    %0 = vector.load %arg1[%c0, %c0_0, %c0_1] : memref<1x8x32xf32, #tpu.memory_space<vmem>>, vector<1x8x32xf32>
    %1 = vector.shape_cast %0 : vector<1x8x32xf32> to vector<8x32xf32>
    %2 = arith.truncf %1 : vector<8x32xf32> to vector<8x32xbf16>
    %3 = vector.shape_cast %2 : vector<8x32xbf16> to vector<1x8x32xbf16>
    %4 = vector.broadcast %3 : vector<1x8x32xbf16> to vector<4x8x32xbf16>
    %c0_2 = arith.constant 0 : index
    %c0_3 = arith.constant 0 : index
    %c0_4 = arith.constant 0 : index
    %5 = vector.load %arg2[%c0_2, %c0_3, %c0_4] : memref<4x32x24xbf16, #tpu.memory_space<vmem>>, vector<4x32x24xbf16>
    "tpu.trace_start"() <{level = 10 : i32, message = "hsd,hdf->hsf"}> : () -> ()
    %cst = arith.constant dense<0.000000e+00> : vector<4x8x24xf32>
    %6 = tpu.matmul %4, %5, %cst {dimension_numbers = #tpu.dot_dimension_numbers<[2], [1], [1], [2], [0, 0, 0, 1, 1, 2], [0], [0]>} : vector<4x8x32xbf16>, vector<4x32x24xbf16>, vector<4x8x24xf32> -> vector<4x8x24xf32>
    "tpu.trace_stop"() : () -> ()
    %c0_5 = arith.constant 0 : index
    %c0_6 = arith.constant 0 : index
    %c0_7 = arith.constant 0 : index
    %7 = vector.load %arg3[%c0_5, %c0_6, %c0_7] : memref<4x1x24xf32, #tpu.memory_space<vmem>>, vector<4x1x24xf32>
    %8 = vector.broadcast %7 : vector<4x1x24xf32> to vector<4x8x24xf32>
    %9 = arith.addf %6, %8 : vector<4x8x24xf32>
    %10 = vector.extract_strided_slice %9 {offsets = [0, 0, 0], sizes = [4, 8, 8], strides = [1, 1, 1]} : vector<4x8x24xf32> to vector<4x8x8xf32>
    %cst_8 = arith.constant 0.353553385 : f32
    %11 = vector.broadcast %cst_8 : f32 to vector<4x8x8xf32>
    %12 = arith.mulf %10, %11 : vector<4x8x8xf32>
    %13 = arith.truncf %12 : vector<4x8x8xf32> to vector<4x8x8xbf16>
    %14 = vector.extract_strided_slice %9 {offsets = [0, 0, 8], sizes = [4, 8, 8], strides = [1, 1, 1]} : vector<4x8x24xf32> to vector<4x8x8xf32>
    %15 = arith.truncf %14 : vector<4x8x8xf32> to vector<4x8x8xbf16>
    %16 = vector.extract_strided_slice %9 {offsets = [0, 0, 16], sizes = [4, 8, 8], strides = [1, 1, 1]} : vector<4x8x24xf32> to vector<4x8x8xf32>
    %17 = arith.truncf %16 : vector<4x8x8xf32> to vector<4x8x8xbf16>
    "tpu.trace_start"() <{level = 10 : i32, message = "hqd,hkd->hqk"}> : () -> ()
    %cst_9 = arith.constant dense<0.000000e+00> : vector<4x8x8xf32>
    %18 = tpu.matmul %13, %15, %cst_9 {dimension_numbers = #tpu.dot_dimension_numbers<[2], [2], [1], [1], [0, 0, 0, 1, 1, 1], [0], [0]>} : vector<4x8x8xbf16>, vector<4x8x8xbf16>, vector<4x8x8xf32> -> vector<4x8x8xf32>
    "tpu.trace_stop"() : () -> ()
    %cst_10 = arith.constant dense<0xFF800000> : vector<4x8xf32>
    %19 = vector.multi_reduction <maximumf>, %18, %cst_10 [2] : vector<4x8x8xf32> to vector<4x8xf32>
    %20 = vector.shape_cast %19 : vector<4x8xf32> to vector<4x8x1xf32>
    %21 = vector.broadcast %20 : vector<4x8x1xf32> to vector<4x8x8xf32>
    %22 = arith.subf %18, %21 : vector<4x8x8xf32>
    %23 = math.exp %22 : vector<4x8x8xf32>
    %cst_11 = arith.constant dense<0.000000e+00> : vector<4x8xf32>
    %24 = vector.multi_reduction <add>, %23, %cst_11 [2] : vector<4x8x8xf32> to vector<4x8xf32>
    %25 = vector.shape_cast %24 : vector<4x8xf32> to vector<4x8x1xf32>
    %26 = tpu.reciprocal %25 {approx = true} : vector<4x8x1xf32> -> vector<4x8x1xf32>
    %27 = vector.broadcast %26 : vector<4x8x1xf32> to vector<4x8x8xf32>
    %28 = arith.mulf %23, %27 : vector<4x8x8xf32>
    %29 = arith.truncf %28 : vector<4x8x8xf32> to vector<4x8x8xbf16>
    "tpu.trace_start"() <{level = 10 : i32, message = "hqk,hkd->hqd"}> : () -> ()
    %cst_12 = arith.constant dense<0.000000e+00> : vector<4x8x8xf32>
    %30 = tpu.matmul %29, %17, %cst_12 {dimension_numbers = #tpu.dot_dimension_numbers<[2], [1], [1], [2], [0, 0, 0, 1, 1, 2], [0], [0]>} : vector<4x8x8xbf16>, vector<4x8x8xbf16>, vector<4x8x8xf32> -> vector<4x8x8xf32>
    "tpu.trace_stop"() : () -> ()
    %31 = arith.truncf %30 : vector<4x8x8xf32> to vector<4x8x8xbf16>
    %c0_13 = arith.constant 0 : index
    %c0_14 = arith.constant 0 : index
    %c0_15 = arith.constant 0 : index
    %32 = vector.load %arg4[%c0_13, %c0_14, %c0_15] : memref<4x8x32xbf16, #tpu.memory_space<vmem>>, vector<4x8x32xbf16>
    "tpu.trace_start"() <{level = 10 : i32, message = "hsd,hdo->hso"}> : () -> ()
    %cst_16 = arith.constant dense<0.000000e+00> : vector<4x8x32xf32>
    %33 = tpu.matmul %31, %32, %cst_16 {dimension_numbers = #tpu.dot_dimension_numbers<[2], [1], [1], [2], [0, 0, 0, 1, 1, 2], [0], [0]>} : vector<4x8x8xbf16>, vector<4x8x32xbf16>, vector<4x8x32xf32> -> vector<4x8x32xf32>
    "tpu.trace_stop"() : () -> ()
    %cst_17 = arith.constant dense<0.000000e+00> : vector<8x32xf32>
    %34 = vector.multi_reduction <add>, %33, %cst_17 [0] : vector<4x8x32xf32> to vector<8x32xf32>
    %c0_18 = arith.constant 0 : index
    %c0_19 = arith.constant 0 : index
    %35 = vector.load %arg5[%c0_18, %c0_19] : memref<1x32xf32, #tpu.memory_space<vmem>>, vector<1x32xf32>
    %36 = vector.broadcast %35 : vector<1x32xf32> to vector<8x32xf32>
    %37 = arith.addf %34, %36 : vector<8x32xf32>
    %38 = arith.addf %37, %1 : vector<8x32xf32>
    %cst_20 = arith.constant dense<0.000000e+00> : vector<8xf32>
    %39 = vector.multi_reduction <add>, %38, %cst_20 [1] : vector<8x32xf32> to vector<8xf32>
    %40 = vector.shape_cast %39 : vector<8xf32> to vector<8x1xf32>
    %cst_21 = arith.constant 3.200000e+01 : f32
    %41 = vector.broadcast %cst_21 : f32 to vector<8x1xf32>
    %42 = arith.divf %40, %41 : vector<8x1xf32>
    %43 = vector.broadcast %42 : vector<8x1xf32> to vector<8x32xf32>
    %44 = arith.subf %38, %43 : vector<8x32xf32>
    %45 = arith.mulf %44, %44 : vector<8x32xf32>
    %cst_22 = arith.constant dense<0.000000e+00> : vector<8xf32>
    %46 = vector.multi_reduction <add>, %45, %cst_22 [1] : vector<8x32xf32> to vector<8xf32>
    %47 = vector.shape_cast %46 : vector<8xf32> to vector<8x1xf32>
    %cst_23 = arith.constant 3.200000e+01 : f32
    %48 = vector.broadcast %cst_23 : f32 to vector<8x1xf32>
    %49 = arith.divf %47, %48 : vector<8x1xf32>
    %c0_24 = arith.constant 0 : index
    %c0_25 = arith.constant 0 : index
    %50 = vector.load %arg6[%c0_24, %c0_25] : memref<1x32xf32, #tpu.memory_space<vmem>>, vector<1x32xf32>
    %cst_26 = arith.constant 9.99999996E-13 : f32
    %51 = vector.broadcast %cst_26 : f32 to vector<8x1xf32>
    %52 = arith.addf %49, %51 : vector<8x1xf32>
    %53 = math.rsqrt %52 : vector<8x1xf32>
    %54 = vector.broadcast %53 : vector<8x1xf32> to vector<8x32xf32>
    %55 = arith.mulf %44, %54 : vector<8x32xf32>
    %56 = vector.broadcast %50 : vector<1x32xf32> to vector<8x32xf32>
    %57 = arith.mulf %56, %55 : vector<8x32xf32>
    %c0_27 = arith.constant 0 : index
    %c0_28 = arith.constant 0 : index
    %58 = vector.load %arg7[%c0_27, %c0_28] : memref<1x32xf32, #tpu.memory_space<vmem>>, vector<1x32xf32>
    %59 = vector.broadcast %58 : vector<1x32xf32> to vector<8x32xf32>
    %60 = arith.addf %57, %59 : vector<8x32xf32>
    %61 = arith.truncf %60 : vector<8x32xf32> to vector<8x32xbf16>
    %c0_29 = arith.constant 0 : index
    %c0_30 = arith.constant 0 : index
    %62 = vector.load %arg8[%c0_29, %c0_30] : memref<32x128xbf16, #tpu.memory_space<vmem>>, vector<32x128xbf16>
    %cst_31 = arith.constant dense<0.000000e+00> : vector<8x128xf32>
    %63 = tpu.matmul %61, %62, %cst_31 {dimension_numbers = #tpu.dot_dimension_numbers<[1], [0], [0], [1], [0, 0, 1, 1], [], []>} : vector<8x32xbf16>, vector<32x128xbf16>, vector<8x128xf32> -> vector<8x128xf32>
    %c0_32 = arith.constant 0 : index
    %c0_33 = arith.constant 0 : index
    %64 = vector.load %arg9[%c0_32, %c0_33] : memref<1x128xf32, #tpu.memory_space<vmem>>, vector<1x128xf32>
    %65 = vector.broadcast %64 : vector<1x128xf32> to vector<8x128xf32>
    %66 = arith.addf %63, %65 : vector<8x128xf32>
    %c0_34 = arith.constant 0 : index
    %c0_35 = arith.constant 0 : index
    %c0_36 = arith.constant 0 : index
    %67 = vector.load %arg10[%c0_34, %c0_35, %c0_36] : memref<1x8x128xf32, #tpu.memory_space<vmem>>, vector<1x8x128xf32>
    %68 = vector.shape_cast %67 : vector<1x8x128xf32> to vector<8x128xf32>
    %69 = vector.shape_cast %66 : vector<8x128xf32> to vector<1x8x128xf32>
    tpu.vector_store %arg10[%c0_34, %c0_35, %c0_36], %69 {strides = array<i32>} : memref<1x8x128xf32, #tpu.memory_space<vmem>>, vector<1x8x128xf32>,
    return
  }
  func.func @transform_0(%arg0: i32) -> (i32, i32, i32) {
    %c0_i32 = arith.constant 0 : i32
    %c0_i32_0 = arith.constant 0 : i32
    %c0_i32_1 = arith.constant 0 : i32
    return %arg0, %c0_i32, %c0_i32_0 : i32, i32, i32
  }
  func.func @transform_1(%arg0: i32) -> (i32, i32, i32) {
    %c0_i32 = arith.constant 0 : i32
    %c0_i32_0 = arith.constant 0 : i32
    %c0_i32_1 = arith.constant 0 : i32
    %c0_i32_2 = arith.constant 0 : i32
    return %c0_i32, %c0_i32_0, %c0_i32_1 : i32, i32, i32
  }
  func.func @transform_2(%arg0: i32) -> (i32, i32, i32) {
    %c0_i32 = arith.constant 0 : i32
    %c0_i32_0 = arith.constant 0 : i32
    %c0_i32_1 = arith.constant 0 : i32
    %c0_i32_2 = arith.constant 0 : i32
    return %c0_i32, %c0_i32_0, %c0_i32_1 : i32, i32, i32
  }
  func.func @transform_3(%arg0: i32) -> (i32, i32, i32) {
    %c0_i32 = arith.constant 0 : i32
    %c0_i32_0 = arith.constant 0 : i32
    %c0_i32_1 = arith.constant 0 : i32
    %c0_i32_2 = arith.constant 0 : i32
    return %c0_i32, %c0_i32_0, %c0_i32_1 : i32, i32, i32
  }
  func.func @transform_4(%arg0: i32) -> (i32, i32) {
    %c0_i32 = arith.constant 0 : i32
    %c0_i32_0 = arith.constant 0 : i32
    %c0_i32_1 = arith.constant 0 : i32
    return %c0_i32, %c0_i32_0 : i32, i32
  }
  func.func @transform_5(%arg0: i32) -> (i32, i32) {
    %c0_i32 = arith.constant 0 : i32
    %c0_i32_0 = arith.constant 0 : i32
    %c0_i32_1 = arith.constant 0 : i32
    return %c0_i32, %c0_i32_0 : i32, i32
  }
  func.func @transform_6(%arg0: i32) -> (i32, i32) {
    %c0_i32 = arith.constant 0 : i32
    %c0_i32_0 = arith.constant 0 : i32
    %c0_i32_1 = arith.constant 0 : i32
    return %c0_i32, %c0_i32_0 : i32, i32
  }
  func.func @transform_7(%arg0: i32) -> (i32, i32) {
    %c0_i32 = arith.constant 0 : i32
    %c0_i32_0 = arith.constant 0 : i32
    %c0_i32_1 = arith.constant 0 : i32
    return %c0_i32, %c0_i32_0 : i32, i32
  }
  func.func @transform_8(%arg0: i32) -> (i32, i32) {
    %c0_i32 = arith.constant 0 : i32
    %c0_i32_0 = arith.constant 0 : i32
    %c0_i32_1 = arith.constant 0 : i32
    return %c0_i32, %c0_i32_0 : i32, i32
  }
  func.func @transform_9(%arg0: i32) -> (i32, i32, i32) {
    %c0_i32 = arith.constant 0 : i32
    %c0_i32_0 = arith.constant 0 : i32
    %c0_i32_1 = arith.constant 0 : i32
    return %arg0, %c0_i32, %c0_i32_0 : i32, i32, i32
  }
}

</mosaic_0001>

<bundles_post_ra>
// kernel: tpu_custom_call.1
= control target key start
LH: loop header
LB: loop body
LE: loop exit
PB: predicated region body
PF: predicated region fallthrough
CT: control target
= control target key end

     0   :  { %14 = vsyncpa [#allocation3], 0  ;;  %s2092_s0 = inlined_call_operand.vmem [shape: f32[2,8,32], index: 0, kind: input, shape index: {}]   ;;  %s2093_s1 = inlined_call_operand.vmem [shape: bf16[4,32,24], index: 1, kind: input, shape index: {}]   ;;  %s2094_s2 = inlined_call_operand.vmem [shape: f32[4,1,24], index: 2, kind: input, shape index: {}]   ;;  %s2095_s3 = inlined_call_operand.vmem [shape: bf16[4,8,32], index: 3, kind: input, shape index: {}]   ;;  %s2096_s4 = inlined_call_operand.vmem [shape: f32[1,32], index: 4, kind: input, shape index: {}]   ;;  %s2097_s5 = inlined_call_operand.vmem [shape: f32[1,32], index: 5, kind: input, shape index: {}]   ;;  %s2098_s6 = inlined_call_operand.vmem [shape: f32[1,32], index: 6, kind: input, shape index: {}]   ;;  %s2099_s7 = inlined_call_operand.vmem [shape: bf16[32,128], index: 7, kind: input, shape index: {}]   ;;  %s2100_s8 = inlined_call_operand.vmem [shape: f32[1,128], index: 8, kind: input, shape index: {}]   ;;  %s2101_s9 = inlined_call_operand.hbm [shape: f32[2,8,128], index: 9, kind: output, shape index: {}]  }
   0x1   :  { %16 = vsyncpa [#allocation3 + $0x1], 0  ;;  %s1802_s30 = smov 0   ;;  %s1804_s10 = smov 0  }
   0x2   :  { %s1806_s11 = smov 0   ;;  %s1808_s12 = smov 0  }
   0x3 LB: > { %s1823_s13 = sadd.s32 4294967295, %s1745_s12   ;;  %s1416_s14 = sadd.s32 4294967294, %s1745_s12   ;;  %s1745_s12 = sphi %s1808_s12, %s2107_s12   ;;  %s1741_s11 = sphi %s1806_s11, %s2106_s11   ;;  %s1737_s10 = sphi %s1804_s10, %s2105_s10   ;;  %s1733_s30 = sphi %s1802_s30, %s2104_s30  }
   0x4   : > { %s1827_s15 = sadd.s32 1, %s1745_s12   ;;  %s223_s16 = sadd.s32 1, %s1741_s11 }
   0x5   : > { %s220_s17 = ssub.s32 %s1745_s12, %s1827_s15  ;;  %p233_p0 = scmp.ne.s32.totalorder %s1741_s11, %s1737_s10 }
   0x6   : > { %p221_p1 = scmp.eq.s32.totalorder %s220_s17, 0  ;;  %p234_p2 = scmp.eq.s32.totalorder %s1823_s13, 1 }
   0x7   : > { %p239_p3 = scmp.ne.s32.totalorder %s1737_s10, %s1733_s30  ;;  %p240_p4 = scmp.eq.s32.totalorder %s1416_s14, 1 }
   0x8   : > { %s1838_s18 = scalar_select %p221_p1, %s1741_s11, %s223_s16  }
   0x9   : > { %p1840_p5 = por %p234_p2, %p233_p0  ;;  %p1844_p6 = por %p240_p4, %p239_p3 }
   0xa   : > { %p1419_p7 = scmp.ge.s32.totalorder %s1745_s12, 1  ;;  %p289_p8 = scmp.lt.s32.totalorder %s1745_s12, 3 }
   0xc   : > { %p290_p9 = pnand %p1419_p7, %p289_p8 }
   0xd   : > { %v1655_v0 = vld [vmem:[%s2093_s1] sm:$0xff] (!%p290_p9)   ;;  %v1747_v1 = vmov (!%p290_p9), 0.0   ;;  %v1656_v2 = vld [vmem:[%s2093_s1 + $0x10] sm:$0xff] (!%p290_p9)   ;;  %v1657_v3 = vld [vmem:[%s2093_s1 + $0x8] sm:$0xff] (!%p290_p9)   ;;  %vm1748_vm0 = vmmov (!%p290_p9), 0   ;;  %p324_p10 = scmp.lt.s32.totalorder (!%p290_p9), %s1823_s13, 1 }
   0xe   : > { %293 = sbr.rel (%p290_p9) target bundleno = 1884 (0x75c), region = 56  ;;  %1500 = vmatprep.subr.bf16.mxu0 (!%p290_p9), %v1747_v1  ;;  %1508 = vmatprep.subr.bf16.mxu1 (!%p290_p9), %v1747_v1  ;;  %v1658_v4 = vld [vmem:[%s2093_s1 + $0x18] sm:$0xff] (!%p290_p9)   ;;  %v1659_v5 = vld [vmem:[%s2093_s1 + $0x20] sm:$0xff] (!%p290_p9)   ;;  %vm387_vm1 = vcmask (!%p290_p9), 261120   ;;  %v1660_v7 = vld [vmem:[%s2093_s1 + $0x30] sm:$0xff] (!%p290_p9)   ;;  %s1749_s22 = smov (!%p290_p9), 120  }
   0xf   : > { %1501 = vmatpush3.bf16.msra.mxu0 (!%p290_p9), %v1655_v0  ;;  %1504 = vmatprep.mubr.msk.bf16.mxu0 (!%p290_p9), %vm1748_vm0, %v1747_v1  ;;  %v1661_v9 = vld [vmem:[%s2093_s1 + $0x28] sm:$0xff] (!%p290_p9)   ;;  %v1662_v10 = vld [vmem:[%s2093_s1 + $0x38] sm:$0xff] (!%p290_p9)   ;;  %v1422_v11 = vld [vmem:[%s2094_s2] ss:$0 sm:$0xff] (!%p290_p9)  ;;  %vm602_vm2 = vcmask (!%p290_p9), 64512   ;;  %s1750_s27 = smov (!%p290_p9), 112  }
  0x10   : > { %1509 = vmatpush3.bf16.msra.mxu1 (!%p290_p9), %v1656_v2  ;;  %1502 = vmatprep.subr.bf16.mxu0 (!%p290_p9), %v1747_v1  ;;  %v1423_v12 = vld [vmem:[%s2094_s2 + $0x1] ss:$0 sm:$0xff] (!%p290_p9)  ;;  %v1424_v25 = vld [vmem:[%s2094_s2 + $0x2] ss:$0 sm:$0xff] (!%p290_p9)  ;;  %v1425_v26 = vld [vmem:[%s2094_s2 + $0x3] ss:$0 sm:$0xff] (!%p290_p9) }
  0x11   : > { %1510 = vmatprep.subr.bf16.mxu1 (!%p290_p9), %v1747_v1  ;;  %1512 = vmatprep.mubr.msk.bf16.mxu1 (!%p290_p9), %vm1748_vm0, %v1747_v1  ;;  %vm849_vm3 = vcmask (!%p290_p9), 1043456   ;;  %s1458_s26 = sshll.u32 (!%p290_p9), %s1823_s13, 7 }
  0x12   : > { %s2050_s16 = scalar_lea.hbm (!%p290_p9), %s2101_s9, %s1458_s26 }
  0x13   : > { %1503 = vmatpush3.bf16.msra.mxu0 (!%p290_p9), %v1657_v3 }
  0x14   : > { %1511 = vmatpush3.bf16.msra.mxu1 (!%p290_p9), %v1658_v4  ;;  %1516 = vmatprep.subr.bf16.mxu0 (!%p290_p9), %v1747_v1 }
  0x15   : > { %s325_s29 = scalar_select %p324_p10, %s1823_s13, 1  ;;  %1524 = vmatprep.subr.bf16.mxu1 %v1747_v1 }
  0x17   : > { %s1421_s14 = sshll.u32 %s325_s29, 3 }
  0x18   : > { %s327_s21 = scalar_lea.vmem %s2092_s0, %s1421_s14 }
  0x19   : > { %v1879_v6 = vld [vmem:[%s327_s21] sm:$0xff]  ;;  %s1751_s21 = smov [#allocation2]  }
  0x1a   : > { %v330_v8 = vpack.c.bf16 %v1879_v6, %v1879_v6 }
  0x1c   : > { %1505 = vmatmul.mubr.msk.bf16.vlgmr.msra.gmra.mrb[0].mxu0 %vm387_vm1, %v330_v8  ;;  %1513 = vmatmul.mubr.msk.bf16.vlgmr.msra.gmra.mrb[0].mxu1 %vm387_vm1, %v330_v8 }
  0x1d   : > { %1517 = vmatpush3.bf16.msra.mxu0 %v1659_v5  ;;  %1525 = vmatpush3.bf16.msra.mxu1 %v1660_v7 }
  0x1e   : > { %1518 = vmatprep.subr.bf16.mxu0 %v1747_v1  ;;  %1526 = vmatprep.subr.bf16.mxu1 %v1747_v1 }
  0x1f   : > { %1520 = vmatprep.mubr.msk.bf16.mxu0 %vm1748_vm0, %v1747_v1  ;;  %1528 = vmatprep.mubr.msk.bf16.mxu1 %vm1748_vm0, %v1747_v1 }
  0x21   : > { %1519 = vmatpush3.bf16.msra.mxu0 %v1661_v9  ;;  %1527 = vmatpush3.bf16.msra.mxu1 %v1662_v10 }
  0x22   : > { %1532 = vmatprep.subr.bf16.mxu0 %v1747_v1  ;;  %1538 = vmatprep.subr.bf16.mxu1 %v1747_v1 }
  0x24   : > { %1521 = vmatmul.mubr.msk.bf16.vlgmr.msra.gmra.mrb[4].mxu0 %vm387_vm1, %v330_v8  ;;  %1529 = vmatmul.mubr.msk.bf16.vlgmr.msra.gmra.mrb[4].mxu1 %vm387_vm1, %v330_v8 }
  0x25   : > { %1534 = vmatprep.mubr.msk.bf16.mxu0 %vm1748_vm0, %v1747_v1  ;;  %1540 = vmatprep.mubr.msk.bf16.mxu1 %vm1748_vm0, %v1747_v1 }
  0xef   : > { %v425_v13 = vpop.f32.mrb[0].mxu0  ;;  %v477_v14 = vpop.f32.mrb[0].mxu1 }
  0xf0   : > { %v426_v15 = vadd.f32 %v1422_v11, %v425_v13  ;;  %v1506_v16 = vpop.f32.mrb[1].mxu0  ;;  %v478_v17 = vadd.f32 %v1423_v12, %v477_v14  ;;  %v1514_v18 = vpop.f32.mrb[1].mxu1 }
  0xf1   : > { %v428_v19 = vpop.f32.mrb[2].mxu0  ;;  %v480_v20 = vpop.f32.mrb[2].mxu1 }
  0xf2   : > { %v1507_v21 = vpop.f32.mrb[3].mxu0  ;;  %v1515_v22 = vpop.f32.mrb[3].mxu1  ;;  %v1915_v23 = vpack.c.bf16 %v426_v15, %v426_v15  ;;  %v1917_v24 = vpack.c.bf16 %v478_v17, %v478_v17  ;;  %v587_v41 = vmul.f32 0.35355338, %v426_v15  ;;  %v588_v45 = vmul.f32 0.35355338, %v478_v17 }
  0xf4   : > { %600 = vrot.lane.b32.xlu0 %v1915_v23, %s1749_s22  ;;  %v591_v44 = vpack.c.bf16 %v587_v41, %v587_v41  ;;  %v592_v48 = vpack.c.bf16 %v588_v45, %v588_v45 }
  0xf7   : > { %v529_v27 = vpop.f32.mrb[4].mxu0  ;;  %v581_v28 = vpop.f32.mrb[4].mxu1 }
  0xf8   : > { %v530_v29 = vadd.f32 %v1424_v25, %v529_v27  ;;  %v582_v30 = vadd.f32 %v1425_v26, %v581_v28  ;;  %650 = vrot.lane.b32.xlu0 %v1917_v24, %s1749_s22  ;;  %v1522_v31 = vpop.f32.mrb[5].mxu0  ;;  %v1530_v32 = vpop.f32.mrb[5].mxu1 }
  0xf9   : > { %v532_v33 = vpop.f32.mrb[6].mxu0  ;;  %v584_v34 = vpop.f32.mrb[6].mxu1 }
  0xfa   : > { %v1523_v35 = vpop.f32.mrb[7].mxu0  ;;  %v1531_v36 = vpop.f32.mrb[7].mxu1  ;;  %v1927_v37 = vpack.c.bf16 %v530_v29, %v530_v29  ;;  %v1929_v38 = vpack.c.bf16 %v582_v30, %v582_v30  ;;  %v589_v49 = vmul.f32 0.35355338, %v530_v29  ;;  %v590_v53 = vmul.f32 0.35355338, %v582_v30 }
  0xfc   : > { %699 = vrot.lane.b32.xlu1 %v1927_v37, %s1749_s22  ;;  %v593_v52 = vpack.c.bf16 %v589_v49, %v589_v49  ;;  %v594_v54 = vpack.c.bf16 %v590_v53, %v590_v53 }
 0x100   : > { %748 = vrot.lane.b32.xlu1 %v1929_v38, %s1749_s22  ;;  %s321_s22 = sand.u32 1, %s1737_s10  }
 0x101   : > { %s1420_s23 = sshll.u32 %s321_s22, 3  ;;  %s1344_s17 = scalar_lea.sflag [#allocation3], %s321_s22 }
 0x166   : > { %v601_v39 = vpop.permute.xlu0 %600 }
 0x167   : > { %v607_v40 = vsel %vm602_vm2, %v601_v39, 0 }
 0x168   : > { %1533 = vmatpush3.bf16.xpose.msra.mxu0 %v607_v40 }
 0x169   : > { %1544 = vmatprep.subr.bf16.mxu0 %v1747_v1 }
 0x16a   : > { %v651_v42 = vpop.permute.xlu0 %650 }
 0x16b   : > { %v656_v43 = vsel %vm602_vm2, %v651_v42, 0 }
 0x16c   : > { %1539 = vmatpush3.bf16.xpose.msra.mxu1 %v656_v43 }
 0x16d   : > { %1550 = vmatprep.subr.bf16.mxu1 %v1747_v1 }
 0x16e   : > { %v700_v46 = vpop.permute.xlu1 %699 }
 0x16f   : > { %v705_v47 = vsel %vm602_vm2, %v700_v46, 0  ;;  %1535 = vmatmul.mubr.msk.bf16.vlgmr.msra.gmra.mrb[8].mxu0 %vm602_vm2, %v591_v44 }
 0x170   : > { %1545 = vmatpush3.bf16.xpose.msra.mxu0 %v705_v47  ;;  %1546 = vmatprep.mubr.msk.bf16.mxu0 %vm1748_vm0, %v1747_v1 }
 0x171   : > { %1556 = vmatprep.subr.bf16.mxu0 %v1747_v1 }
 0x172   : > { %v749_v50 = vpop.permute.xlu1 %748 }
 0x173   : > { %v754_v51 = vsel %vm602_vm2, %v749_v50, 0  ;;  %1541 = vmatmul.mubr.msk.bf16.vlgmr.msra.gmra.mrb[8].mxu1 %vm602_vm2, %v592_v48 }
 0x174   : > { %1551 = vmatpush3.bf16.xpose.msra.mxu1 %v754_v51  ;;  %1552 = vmatprep.mubr.msk.bf16.mxu1 %vm1748_vm0, %v1747_v1 }
 0x175   : > { %1562 = vmatprep.subr.bf16.mxu1 %v1747_v1 }
 0x177   : > { %1547 = vmatmul.mubr.msk.bf16.vlgmr.msra.gmra.mrb[12].mxu0 %vm602_vm2, %v593_v52 }
 0x178   : > { %1558 = vmatprep.mubr.msk.bf16.mxu0 %vm1748_vm0, %v1747_v1 }
 0x17b   : > { %1553 = vmatmul.mubr.msk.bf16.vlgmr.msra.gmra.mrb[12].mxu1 %vm602_vm2, %v594_v54 }
 0x17c   : > { %1564 = vmatprep.mubr.msk.bf16.mxu1 %vm1748_vm0, %v1747_v1 }
 0x242   : > { %v643_v55 = vpop.f32.mrb[8].mxu0 }
 0x243   : > { %v1536_v56 = vpop.f32.mrb[9].mxu0  ;;  %v796_v57 = vsel %vm602_vm2, %v643_v55, -inf }
 0x244   : > { %797 = vmax.xlane.f32.xlu0 %v796_v57  ;;  %v646_v58 = vpop.f32.mrb[10].mxu0  ;;  %v1041_v57 = vld [vmem:[%s2095_s3] sm:$0xf] }
 0x245   : > { %v1537_v59 = vpop.f32.mrb[11].mxu0  ;;  %v1049_v58 = vsel %vm849_vm3, %v1041_v57, 0 }
 0x246   : > { %v692_v60 = vpop.f32.mrb[8].mxu1  ;;  %v1042_v59 = vld [vmem:[%s2095_s3 + $0x4] sm:$0xf] }
 0x247   : > { %v1542_v61 = vpop.f32.mrb[9].mxu1  ;;  %v799_v62 = vsel %vm602_vm2, %v692_v60, -inf }
 0x248   : > { %v695_v63 = vpop.f32.mrb[10].mxu1  ;;  %800 = vmax.xlane.f32.xlu1 %v799_v62  ;;  %v1043_v61 = vld [vmem:[%s2095_s3 + $0x8] sm:$0xf] }
 0x249   : > { %v1543_v0 = vpop.f32.mrb[11].mxu1 }
 0x24a   : > { %v741_v2 = vpop.f32.mrb[12].mxu0 }
 0x24b   : > { %v1548_v3 = vpop.f32.mrb[13].mxu0  ;;  %v802_v4 = vsel %vm602_vm2, %v741_v2, -inf }
 0x24c   : > { %803 = vmax.xlane.f32.xlu0 %v802_v4  ;;  %v744_v5 = vpop.f32.mrb[14].mxu0 }
 0x24d   : > { %v1549_v7 = vpop.f32.mrb[15].mxu0  ;;  %v1044_v5 = vld [vmem:[%s2095_s3 + $0xc] sm:$0xf] }
 0x24e   : > { %v790_v8 = vpop.f32.mrb[12].mxu1 }
 0x24f   : > { %v1554_v9 = vpop.f32.mrb[13].mxu1  ;;  %v805_v10 = vsel %vm602_vm2, %v790_v8, -inf }
 0x250   : > { %v793_v11 = vpop.f32.mrb[14].mxu1  ;;  %806 = vmax.xlane.f32.xlu0 %v805_v10  ;;  %v1187_v10 = vsel %vm849_vm3, %v1044_v5, 0 }
 0x251   : > { %v1555_v12 = vpop.f32.mrb[15].mxu1 }
 0x259   : > { %844 = vrot.lane.b32.xlu1 %v1915_v23, %s1750_s27 }
 0x2d1   : > { %v798_v13 = vpop.xlane.xlu0 %797 }
 0x2d2   : > { %v808_v14 = vsub.f32 %v643_v55, %v798_v13 }
 0x2d4   : > { %v812_v15 = vmul.f32 1.442695, %v808_v14 }
 0x2d5   : > { %v801_v16 = vpop.xlane.xlu1 %800 }
 0x2d6   : > { %1665 = vpow2.f32 %v812_v15  ;;  %v809_v17 = vsub.f32 %v692_v60, %v801_v16  ;;  %v1095_v60 = vsel %vm849_vm3, %v1042_v59, 0 }
 0x2d8   : > { %v814_v18 = vmul.f32 1.442695, %v809_v17 }
 0x2d9   : > { %v845_v19 = vpop.permute.xlu1 %844  ;;  %v804_v20 = vpop.xlane.xlu0 %803 }
 0x2da   : > { %1667 = vpow2.f32 %v814_v18  ;;  %v851_v21 = vsel %vm849_vm3, %v845_v19, 0  ;;  %v810_v22 = vsub.f32 %v741_v2, %v804_v20  ;;  %v1141_v2 = vsel %vm849_vm3, %v1043_v61, 0 }
 0x2db   : > { %1557 = vmatpush3.bf16.msra.mxu0 %v851_v21 }
 0x2dc   : > { %v816_v25 = vmul.f32 1.442695, %v810_v22  ;;  %1568 = vmatprep.subr.bf16.mxu0 %v1747_v1 }
 0x2dd   : > { %v807_v26 = vpop.xlane.xlu0 %806 }
 0x2de   : > { %1669 = vpow2.f32 %v816_v25  ;;  %v811_v23 = vsub.f32 %v790_v8, %v807_v26 }
 0x2e0   : > { %v1666_v27 = vpop.eup %1665  ;;  %v818_v28 = vmul.f32 1.442695, %v811_v23 }
 0x2e1   : > { %v820_v29 = vsel %vm602_vm2, %v1666_v27, 0.0 }
 0x2e2   : > { %1671 = vpow2.f32 %v818_v28  ;;  %821 = vadd.xlane.f32.xlu1 %v820_v29 }
 0x2e4   : > { %v1668_v30 = vpop.eup %1667 }
 0x2e5   : > { %v823_v31 = vsel %vm602_vm2, %v1668_v30, 0.0 }
 0x2e6   : > { %824 = vadd.xlane.f32.xlu0 %v823_v31 }
 0x2e8   : > { %v1670_v32 = vpop.eup %1669 }
 0x2e9   : > { %v826_v33 = vsel %vm602_vm2, %v1670_v32, 0.0 }
 0x2ea   : > { %827 = vadd.xlane.f32.xlu1 %v826_v33 }
 0x2ec   : > { %v1672_v34 = vpop.eup %1671 }
 0x2ed   : > { %v829_v35 = vsel %vm602_vm2, %v1672_v34, 0.0 }
 0x2ee   : > { %830 = vadd.xlane.f32.xlu0 %v829_v35 }
 0x2fb   : > { %941 = vrot.lane.b32.xlu1 %v1927_v37, %s1750_s27 }
 0x2ff   : > { %989 = vrot.lane.b32.xlu1 %v1929_v38, %s1750_s27 }
 0x304   : > { %893 = vrot.lane.b32.xlu0 %v1917_v24, %s1750_s27  ;;  %s323_s27 = scalar_lea.vmem [#allocation2], %s1420_s23  ;;  %s1687_s23 = sshll.u32 %s1751_s21, 4  ;;  %s1688_s23 = int_to_ptr.vmem [resolvable:$false] %s1687_s23 }
 0x305   : > { %s1357_s28 = sshll.u32 %s323_s27, 4  ;;  %s1689_s24 = scalar_lea.vmem %s1688_s23, 256  ;;  %s2052_s28 = int_to_ptr.vmem [resolvable:$true] %s1357_s28 }
 0x306   : > { %s1683_s13 = scalar_lea.vmem %s2052_s28, 128  ;;  %p1690_p0 = scmp.lt.s32.totalorder %s2052_s28, %s1688_s23 }
 0x307   : > { %p1684_p11 = scmp.ne.s32.totalorder %s2052_s28, %s1683_s13  ;;  %p1691_p1 = scmp.lt.s32.totalorder %s1689_s24, %s1683_s13 }
 0x309   : > { %p1685_p12 = pnand %p1684_p11, %p1840_p5  ;;  %p1692_p2 = por %p1691_p1, %p1690_p0 }
 0x30b   : > { %p1686_p13 = pneg %p1685_p12 }
 0x30d   : > { %p1693_p3 = pnand %p1692_p2, %p1686_p13 }
 0x36f   : > { %v822_v36 = vpop.xlane.xlu1 %821 }
 0x370   : > { %1673 = vrcp.f32 %v822_v36 }
 0x373   : > { %v825_v39 = vpop.xlane.xlu0 %824 }
 0x374   : > { %1675 = vrcp.f32 %v825_v39 }
 0x377   : > { %v828_v40 = vpop.xlane.xlu1 %827 }
 0x378   : > { %1677 = vrcp.f32 %v828_v40 }
 0x37a   : > { %v1674_v41 = vpop.eup %1673 }
 0x37b   : > { %v836_v42 = vmul.f32 %v1674_v41, %v1666_v27  ;;  %v942_v43 = vpop.permute.xlu1 %941  ;;  %v831_v44 = vpop.xlane.xlu0 %830 }
 0x37c   : > { %1679 = vrcp.f32 %v831_v44  ;;  %v947_v47 = vsel %vm849_vm3, %v942_v43, 0 }
 0x37d   : > { %v840_v45 = vpack.c.bf16 %v836_v42, %v836_v42 }
 0x37e   : > { %v1676_v46 = vpop.eup %1675 }
 0x37f   : > { %v837_v37 = vmul.f32 %v1676_v46, %v1668_v30  ;;  %1559 = vmatmul.mubr.msk.bf16.vlgmr.msra.gmra.mrb[16].mxu0 %vm602_vm2, %v840_v45  ;;  %v894_v38 = vpop.permute.xlu0 %893  ;;  %v990_v48 = vpop.permute.xlu1 %989  ;;  %v1450_v45 = vld [vmem:[%s2096_s4] ss:$0 sm:$0xff] }
 0x380   : > { %1569 = vmatpush3.bf16.msra.mxu0 %v947_v47  ;;  %v899_v24 = vsel %vm849_vm3, %v894_v38, 0  ;;  %1570 = vmatprep.mubr.msk.bf16.mxu0 %vm1748_vm0, %v1747_v1  ;;  %v995_v52 = vsel %vm849_vm3, %v990_v48, 0 }
 0x381   : > { %1563 = vmatpush3.bf16.msra.mxu1 %v899_v24  ;;  %v841_v49 = vpack.c.bf16 %v837_v37, %v837_v37  ;;  %1580 = vmatprep.subr.bf16.mxu0 %v1747_v1 }
 0x382   : > { %v1678_v50 = vpop.eup %1677  ;;  %1574 = vmatprep.subr.bf16.mxu1 %v1747_v1 }
 0x383   : > { %v838_v51 = vmul.f32 %v1678_v50, %v1670_v32 }
 0x384   : > { %1565 = vmatmul.mubr.msk.bf16.vlgmr.msra.gmra.mrb[16].mxu1 %vm602_vm2, %v841_v49 }
 0x385   : > { %1575 = vmatpush3.bf16.msra.mxu1 %v995_v52  ;;  %v842_v53 = vpack.c.bf16 %v838_v51, %v838_v51  ;;  %1576 = vmatprep.mubr.msk.bf16.mxu1 %vm1748_vm0, %v1747_v1 }
 0x386   : > { %v1680_v54 = vpop.eup %1679  ;;  %1586 = vmatprep.subr.bf16.mxu1 %v1747_v1 }
 0x387   : > { %v839_v55 = vmul.f32 %v1680_v54, %v1672_v34  ;;  %1571 = vmatmul.mubr.msk.bf16.vlgmr.msra.gmra.mrb[20].mxu0 %vm602_vm2, %v842_v53 }
 0x388   : > { %1582 = vmatprep.mubr.msk.bf16.mxu0 %vm1748_vm0, %v1747_v1  ;;  %1581 = vmatpush3.bf16.msra.mxu0 %v1049_v58 }
 0x389   : > { %v843_v56 = vpack.c.bf16 %v839_v55, %v839_v55  ;;  %1592 = vmatprep.subr.bf16.mxu0 %v1747_v1  ;;  %v1663_v55 = vld [vmem:[%s2099_s7] sm:$0xff]  }
 0x38c   : > { %1577 = vmatmul.mubr.msk.bf16.vlgmr.msra.gmra.mrb[20].mxu1 %vm602_vm2, %v843_v56 }
 0x38d   : > { %1588 = vmatprep.mubr.msk.bf16.mxu1 %vm1748_vm0, %v1747_v1  ;;  %1587 = vmatpush3.bf16.msra.mxu1 %v1095_v60  ;;  %v1451_v60 = vld [vmem:[%s2097_s5] ss:$0 sm:$0xff] }
 0x38e   : > { %1598 = vmatprep.subr.bf16.mxu1 %v1747_v1 }
 0x452   : > { %v887_v62 = vpop.f32.mrb[16].mxu0 }
 0x453   : > { %v1037_v63 = vpack.c.bf16 %v887_v62, %v887_v62  ;;  %v1560_v0 = vpop.f32.mrb[17].mxu0  ;;  %v1452_v62 = vld [vmem:[%s2098_s6] ss:$0 sm:$0xff] }
 0x454   : > { %v890_v3 = vpop.f32.mrb[18].mxu0 }
 0x455   : > { %v1561_v4 = vpop.f32.mrb[19].mxu0  ;;  %1583 = vmatmul.mubr.msk.bf16.vlgmr.msra.gmra.mrb[24].mxu0 %vm602_vm2, %v1037_v63 }
 0x456   : > { %1593 = vmatpush3.bf16.msra.mxu0 %v1141_v2  ;;  %1594 = vmatprep.mubr.msk.bf16.mxu0 %vm1748_vm0, %v1747_v1 }
 0x457   : > { %v935_v7 = vpop.f32.mrb[16].mxu1  ;;  %1604 = vmatprep.subr.bf16.mxu0 %v1747_v1 }
 0x458   : > { %v1038_v8 = vpack.c.bf16 %v935_v7, %v935_v7  ;;  %v1566_v9 = vpop.f32.mrb[17].mxu1 }
 0x459   : > { %v938_v11 = vpop.f32.mrb[18].mxu1 }
 0x45a   : > { %v1567_v12 = vpop.f32.mrb[19].mxu1  ;;  %v983_v13 = vpop.f32.mrb[20].mxu0  ;;  %1589 = vmatmul.mubr.msk.bf16.vlgmr.msra.gmra.mrb[24].mxu1 %vm602_vm2, %v1038_v8 }
 0x45b   : > { %v1039_v14 = vpack.c.bf16 %v983_v13, %v983_v13  ;;  %v1572_v15 = vpop.f32.mrb[21].mxu0  ;;  %1599 = vmatpush3.bf16.msra.mxu1 %v1187_v10  ;;  %1600 = vmatprep.mubr.msk.bf16.mxu1 %vm1748_vm0, %v1747_v1 }
 0x45c   : > { %v986_v16 = vpop.f32.mrb[22].mxu0 }
 0x45d   : > { %v1573_v17 = vpop.f32.mrb[23].mxu0  ;;  %1595 = vmatmul.mubr.msk.bf16.vlgmr.msra.gmra.mrb[28].mxu0 %vm602_vm2, %v1039_v14 }
 0x45e   : > { %1608 = vmatprep.mubr.msk.bf16.mxu0 %vm1748_vm0, %v1747_v1  ;;  %1605 = vmatpush3.bf16.msra.mxu0 %v1663_v55 }
 0x45f   : > { %v1031_v18 = vpop.f32.mrb[20].mxu1  ;;  %1606 = vmatprep.subr.bf16.mxu0 %v1747_v1  ;;  %v1453_v1 = vld [vmem:[%s2100_s8] ss:$0 sm:$0xff] }
 0x460   : > { %v1040_v19 = vpack.c.bf16 %v1031_v18, %v1031_v18  ;;  %v1578_v20 = vpop.f32.mrb[21].mxu1 }
 0x461   : > { %v1034_v21 = vpop.f32.mrb[22].mxu1 }
 0x462   : > { %v1579_v22 = vpop.f32.mrb[23].mxu1  ;;  %1601 = vmatmul.mubr.msk.bf16.vlgmr.msra.gmra.mrb[28].mxu1 %vm602_vm2, %v1040_v19 }
 0x528   : > { %v1085_v25 = vpop.f32.mrb[24].mxu0 }
 0x529   : > { %v1584_v26 = vpop.f32.mrb[25].mxu0  ;;  %v1229_v29 = vsel %vm387_vm1, %v1085_v25, 0.0 }
 0x52a   : > { %v1088_v23 = vpop.f32.mrb[26].mxu0 }
 0x52b   : > { %v1585_v27 = vpop.f32.mrb[27].mxu0 }
 0x52d   : > { %v1131_v28 = vpop.f32.mrb[24].mxu1 }
 0x52e   : > { %v1230_v30 = vsel %vm387_vm1, %v1131_v28, 0.0  ;;  %v1590_v31 = vpop.f32.mrb[25].mxu1 }
 0x52f   : > { %v1231_v32 = vadd.f32 %v1230_v30, %v1229_v29  ;;  %v1134_v33 = vpop.f32.mrb[26].mxu1 }
 0x530   : > { %v1591_v34 = vpop.f32.mrb[27].mxu1  ;;  %v1177_v35 = vpop.f32.mrb[28].mxu0 }
 0x531   : > { %v1232_v36 = vsel %vm387_vm1, %v1177_v35, 0.0  ;;  %v1596_v39 = vpop.f32.mrb[29].mxu0 }
 0x532   : > { %v1233_v40 = vadd.f32 %v1232_v36, %v1231_v32  ;;  %v1180_v41 = vpop.f32.mrb[30].mxu0 }
 0x533   : > { %v1597_v42 = vpop.f32.mrb[31].mxu0 }
 0x535   : > { %v1223_v43 = vpop.f32.mrb[28].mxu1 }
 0x536   : > { %v1234_v44 = vsel %vm387_vm1, %v1223_v43, 0.0  ;;  %v1602_v46 = vpop.f32.mrb[29].mxu1 }
 0x537   : > { %v1235_v37 = vadd.f32 %v1234_v44, %v1233_v40  ;;  %v1226_v47 = vpop.f32.mrb[30].mxu1 }
 0x538   : > { %v1603_v38 = vpop.f32.mrb[31].mxu1 }
 0x539   : > { %v1243_v24 = vadd.f32 %v1450_v45, %v1235_v37 }
 0x53b   : > { %v1244_v48 = vadd.f32 %v1243_v24, %v1879_v6  ;;  %v1664_v6 = vld [vmem:[%s2099_s7 + $0x8] sm:$0xff]  }
 0x53c   : > { %1607 = vmatpush3.bf16.msra.mxu0 %v1664_v6 }
 0x53d   : > { %v1245_v49 = vsel %vm387_vm1, %v1244_v48, 0.0 }
 0x53e   : > { %1246 = vadd.xlane.f32.xlu0 %v1245_v49 }
 0x5cb   : > { %v1247_v50 = vpop.xlane.xlu0 %1246 }
 0x5cc   : > { %v1249_v51 = vmul.f32 0.03125, %v1247_v50 }
 0x5ce   : > { %v1250_v52 = vsub.f32 %v1244_v48, %v1249_v51 }
 0x5d0   : > { %v1251_v53 = vmul.f32 %v1250_v52, %v1250_v52 }
 0x5d2   : > { %v1252_v54 = vsel %vm387_vm1, %v1251_v53, 0.0 }
 0x5d3   : > { %1253 = vadd.xlane.f32.xlu1 %v1252_v54 }
 0x660   : > { %v1254_v56 = vpop.xlane.xlu1 %1253 }
 0x661   : > { %v1255_v57 = vmul.f32 0.03125, %v1254_v56 }
 0x663   : > { %v1257_v58 = vadd.f32 1e-12, %v1255_v57 }
 0x665   : > { %1681 = vrsqrt.f32 %v1257_v58 }
 0x66f   : > { %v1682_v59 = vpop.eup %1681 }
 0x670   : > { %v1259_v61 = vmul.f32 %v1682_v59, %v1250_v52 }
 0x672   : > { %v1266_v63 = vmul.f32 %v1451_v60, %v1259_v61 }
 0x674   : > { %v1274_v0 = vadd.f32 %v1452_v62, %v1266_v63 }
 0x676   : > { %v1275_v2 = vpack.c.bf16 %v1274_v0, %v1274_v0 }
 0x678   : > { %1609 = vmatmul.mubr.msk.bf16.vlgmr.msra.gmra.mrb[32].mxu0 %vm387_vm1, %v1275_v2 }
 0x74b   : > { %v1336_v3 = vpop.f32.mrb[32].mxu0 }
 0x74c   : > { %v1337_v4 = vadd.f32 %v1453_v1, %v1336_v3  ;;  %v1610_v5 = vpop.f32.mrb[33].mxu0 }
 0x74d   : > { %v1339_v7 = vpop.f32.mrb[34].mxu0 }
 0x74e   : > { %1342 = vst [vmem:[%s323_s27] sm:$0xff] %v1337_v4  ;;  %v1611_v8 = vpop.f32.mrb[35].mxu0 }
 0x74f   : > { %1696 = shalt.err (!%p1693_p3)
}
 0x750   : > { %s1697_s22 = scalar_lea.hbm %s2050_s16, 128  ;;  %s1701_s27 = scalar_lea.hbm %s2101_s9, 256 }
 0x751   : > { %p1698_p4 = scmp.ne.s32.totalorder %s2050_s16, %s1697_s22  ;;  %p1702_p9 = scmp.lt.u32.totalorder %s2050_s16, %s2101_s9 }
 0x752   : > { %p1703_p10 = scmp.lt.u32.totalorder %s1701_s27, %s1697_s22  ;;  %p1705_p12 = scmp.lt.u32.totalorder %s1697_s22, %s2050_s16 }
 0x753   : > { %p1699_p7 = pnand %p1698_p4, %p1840_p5 }
 0x754   : > { %p1704_p11 = por %p1703_p10, %p1702_p9 }
 0x755   : > { %p1700_p8 = pneg %p1699_p7 }
 0x756   : > { %p1706_p13 = por %p1705_p12, %p1704_p11 }
 0x758   : > { %p1707_p0 = pnand %p1706_p13, %p1700_p8 }
 0x75a   : > { %1710 = shalt.err (!%p1707_p0)
}
 0x75b   : > { %1612 = dma.vmem_to_hbm [thread:$0]  (%p1840_p5), %s2052_s28, 128, %s2050_s16, %s1344_s17  }
 0x75c PF: > { %p1618_p1 = scmp.ge.s32.totalorder %s1745_s12, 2  ;;  %s1369_s13 = sand.u32 1, %s1733_s30  }
 0x75d   : > { %s1370_s21 = scalar_lea.sflag [#allocation3], %s1369_s13 }
 0x75e   : > { %p1615_p2 = pnand %p1618_p1, %p1844_p6 }
 0x760   : > { %1728 = dma.done.wait (!%p1615_p2), %s1370_s21, 128  }
 0x761   : > { %1730 = vsyncadd (!%p1615_p2), %s1370_s21, 4294967168  ;;  %p19_p3 = scmp.ge.s32.totalorder %s1827_s15, 4   ;;  %s2104_s30 = smov %s1737_s10 }
 0x762   : > { %s2105_s10 = smov %s1741_s11  ;;  %s2106_s11 = smov %s1838_s18 }
 0x763   : > { %s2107_s12 = smov %s1827_s15  ;;  %21 = sbr.rel (!%p19_p3) target bundleno = 3 (0x3), region = 91 }
 0x76a   :  { %1375 = vsyncpa [#allocation3], 1 }
 0x76b   :  { %1377 = vsyncpa [#allocation3 + $0x1], 1 }

</bundles_post_ra>
